<compile_context>
chip_gen: v7x
topology: tpu7x:2x2x1
jax: 0.10.0
libtpu: 0.0.40
codegen_flags: <defaults>
</compile_context>

<pallas_src>
import functools

import jax
import jax.numpy as jnp
from jax import lax
from jax.experimental import pallas as pl
from jax.experimental.pallas import tpu as pltpu


def _round_up(x, m):
    return ((x + m - 1) // m) * m


def _softmax_loss_kernel(score_ref, valid_ref, sent_gt_ref, match_ref,
                         loss_ref, acc_ref, *, scale, focal, n_real):
    i = pl.program_id(0)

    @pl.when(i == 0)
    def _init():
        acc_ref[0] = jnp.float32(0.0)
        acc_ref[1] = jnp.float32(0.0)

    s = score_ref[...]                                  # (T, Np) f32 raw logits
    validf = valid_ref[...].astype(jnp.float32)         # (T, Np) 1 = valid, 0 = invalid/pad
    gt = sent_gt_ref[...]                               # (T, 1)  i32 gt box index
    match = match_ref[...]                              # (T, 1)  f32 (0 for padded rows)

    tbs, npad = s.shape
    col = lax.broadcasted_iota(jnp.int32, (tbs, npad), 1)
    is_gt = col == gt                                   # (T, Np)

    # Fused one-hot gather of the ground-truth column of the RAW score.
    picked_raw = jnp.sum(jnp.where(is_gt, s, 0.0), axis=-1, keepdims=True)      # (T, 1)

    neg_inf = jnp.float32(-jnp.inf)
    # Mask BEFORE exp: exp(-inf) == 0 exactly, so invalid and padded lanes drop out
    # of the denominator and there is no inf*0 -> NaN hazard.
    scaled_masked = jnp.where(validf > 0.0, s * jnp.float32(scale), neg_inf)
    denom_scaled = jnp.sum(jnp.exp(scaled_masked), axis=-1, keepdims=True)      # (T, 1)

    ce = -(picked_raw * jnp.float32(scale) - jnp.log(denom_scaled + 1e-20))     # (T, 1)

    if focal > 0.0:
        # Reference focal term uses softmax of the RAW score over all real columns
        # (valid or not) -- only the wrapper's lane padding must be excluded.
        raw = s if n_real == npad else jnp.where(col < n_real, s, neg_inf)
        denom_raw = jnp.sum(jnp.exp(raw), axis=-1, keepdims=True)               # (T, 1)
        picked_prob = jnp.exp(picked_raw) / denom_raw                           # (T, 1)
        ce = ce * jnp.power(1.0 - picked_prob, focal) * 0.25

    # Accumulate numerator / denominator of the matched-row mean across grid steps.
    acc_ref[0] += jnp.sum(ce * match)
    acc_ref[1] += jnp.sum(match)

    @pl.when(i == pl.num_programs(0) - 1)
    def _finalize():
        nm = acc_ref[1]
        loss_ref[0, 0] = jnp.where(nm > 0.0, acc_ref[0] / nm, jnp.float32(0.0))


def softmax_loss(score, cls, sent_gt, match, scale=1.0, focal=0.0, tile_rows=None):
    """score, cls: (bs, n); sent_gt: (bs,) int; match: (bs,) {0,1}."""
    bs, n = score.shape
    n_pad = _round_up(n, 128)

    # Row tile: multiple of 32 (int8 sublane packing), capped so one f32 score tile
    # stays around ~1 MiB -> comfortable double-buffered VMEM on v5e/v6e/v7x.
    if tile_rows is None:
        cap = max(32, ((1 << 20) // (4 * n_pad)) // 32 * 32)
        tile_rows = min(1024, cap, _round_up(bs, 32))
    tile_rows = max(32, _round_up(int(tile_rows), 32))
    bs_pad = _round_up(bs, tile_rows)
    num_tiles = bs_pad // tile_rows

    score_f = score.astype(jnp.float32)
    valid = (cls != -1).astype(jnp.int8)               # 4x less HBM traffic than f32 cls
    gt = sent_gt.astype(jnp.int32).reshape(bs, 1)
    mt = match.astype(jnp.float32).reshape(bs, 1)

    if bs_pad != bs or n_pad != n:
        score_p = jnp.zeros((bs_pad, n_pad), jnp.float32).at[:bs, :n].set(score_f)
        valid_p = jnp.zeros((bs_pad, n_pad), jnp.int8).at[:bs, :n].set(valid)   # pad = invalid
        gt_p = jnp.zeros((bs_pad, 1), jnp.int32).at[:bs].set(gt)
        mt_p = jnp.zeros((bs_pad, 1), jnp.float32).at[:bs].set(mt)              # pad = unmatched
    else:
        score_p, valid_p, gt_p, mt_p = score_f, valid, gt, mt

    kernel = functools.partial(_softmax_loss_kernel, scale=float(scale),
                               focal=float(focal), n_real=n)

    cost = pl.CostEstimate(
        flops=8 * bs_pad * n_pad,
        transcendentals=bs_pad * n_pad * (2 if focal > 0.0 else 1),
        bytes_accessed=bs_pad * n_pad * 5 + bs_pad * 8 + 4,
    )

    loss = pl.pallas_call(
        kernel,
        out_shape=jax.ShapeDtypeStruct((1, 1), jnp.float32),
        grid=(num_tiles,),
        in_specs=[
            pl.BlockSpec((tile_rows, n_pad), lambda i: (i, 0)),   # score  (f32)
            pl.BlockSpec((tile_rows, n_pad), lambda i: (i, 0)),   # valid  (int8)
            pl.BlockSpec((tile_rows, 1), lambda i: (i, 0)),       # sent_gt (i32)
            pl.BlockSpec((tile_rows, 1), lambda i: (i, 0)),       # match  (f32)
        ],
        out_specs=pl.BlockSpec((1, 1), lambda i: (0, 0),
                               memory_space=pltpu.MemorySpace.SMEM),
        scratch_shapes=[pltpu.SMEM((2,), jnp.float32)],           # [sum(ce*match), sum(match)]
        compiler_params=pltpu.CompilerParams(
            dimension_semantics=("arbitrary",),
            vmem_limit_bytes=32 * 1024 * 1024,
        ),
        cost_estimate=cost,
    )(score_p, valid_p, gt_p, mt_p)

    # `logits` in the reference is just a copy of the raw score; return it directly
    # instead of paying an extra bs*n*4 B HBM write inside the kernel.
    return {"loss": loss[0, 0]}, score


def _reference(score, cls, sent_gt, match, scale, focal):
    # plain-JAX reference for sanity checking
    scaled = score * scale
    valid = (cls != -1.0).astype(jnp.float32)
    denom = jnp.sum(jnp.exp(scaled) * valid, axis=-1) + 1e-20
    idx = sent_gt[:, None].astype(jnp.int32)
    picked = jnp.take_along_axis(scaled, idx, axis=-1)[:, 0]
    ce = -(picked - jnp.log(denom))
    if focal > 0:
        probs = jax.nn.softmax(score, axis=-1)
        pp = jnp.take_along_axis(probs, idx, axis=-1)[:, 0]
        ce = ce * jnp.power(1.0 - pp, focal) * 0.25
    m = match.astype(jnp.float32)
    nm = jnp.sum(m)
    loss = jnp.where(nm > 0, jnp.sum(ce * m) / nm, 0.0)
    return loss, score


if __name__ == "__main__":
    key = jax.random.PRNGKey(0)
    k1, k2, k3, k4, k5 = jax.random.split(key, 5)

    # --- Case 1 & 2: small shapes from the module spec (bs=2, nbox=8) ---
    bs, n = 2, 8
    score = jax.random.normal(k1, (bs, n), dtype=jnp.float32)
    cls = jnp.array([[0., 1., -1., 2., -1., 3., 4., 5.],
                     [1., -1., -1., 0., 2., 3., -1., 4.]], dtype=jnp.float32)
    sent_gt = jnp.array([3, 0], dtype=jnp.int32)
    match = jnp.array([1, 1], dtype=jnp.int32)

    for scale, focal in ((1.0, 0.0), (20.0, 2.0)):
        loss_dict, logits = softmax_loss(score, cls, sent_gt, match, scale=scale, focal=focal)
        jax.block_until_ready((loss_dict["loss"], logits))
        ref_loss, ref_logits = _reference(score, cls, sent_gt, match, scale, focal)
        assert jnp.allclose(loss_dict["loss"], ref_loss, rtol=1e-5, atol=1e-5), \
            (scale, focal, loss_dict["loss"], ref_loss)
        assert jnp.allclose(logits, ref_logits)

    # --- Case 3: multi-tile grid (row accumulation across grid steps) + lane padding ---
    bs3, n3 = 80, 200
    score3 = jax.random.normal(k2, (bs3, n3), dtype=jnp.float32)
    cls3 = jnp.where(jax.random.uniform(k3, (bs3, n3)) < 0.25, -1.0, 1.0).astype(jnp.float32)
    sent_gt3 = jax.random.randint(k4, (bs3,), 0, n3, dtype=jnp.int32)
    match3 = (jax.random.uniform(k5, (bs3,)) > 0.3).astype(jnp.int32)
    loss_dict3, _ = softmax_loss(score3, cls3, sent_gt3, match3,
                                 scale=5.0, focal=0.0, tile_rows=32)
    jax.block_until_ready(loss_dict3["loss"])
    ref_loss3, _ = _reference(score3, cls3, sent_gt3, match3, 5.0, 0.0)
    assert jnp.allclose(loss_dict3["loss"], ref_loss3, rtol=1e-5, atol=1e-5), \
        (loss_dict3["loss"], ref_loss3)

    # --- Case 4: no matched rows -> loss is exactly 0.0 ---
    loss_dict4, _ = softmax_loss(score, cls, sent_gt, jnp.zeros((bs,), jnp.int32),
                                 scale=1.0, focal=0.0)
    jax.block_until_ready(loss_dict4["loss"])
    assert jnp.allclose(loss_dict4["loss"], 0.0)

    print("KERNEL_OK")
</pallas_src>

<mosaic_0001>
module attributes {stable_mosaic.version = 11 : i64} {
  func.func @_softmax_loss_kernel(%arg0: i32, %arg1: memref<32x128xf32, #tpu.memory_space<vmem>>, %arg2: memref<32x128xi8, #tpu.memory_space<vmem>>, %arg3: memref<32x1xi32, #tpu.memory_space<vmem>>, %arg4: memref<32x1xf32, #tpu.memory_space<vmem>>, %arg5: memref<1x1xf32, #tpu.memory_space<smem>>, %arg6: memref<2xf32, #tpu.memory_space<smem>>) attributes {dimension_semantics = [#tpu.dimension_semantics<arbitrary>], iteration_bounds = array<i64: 1>, scalar_prefetch = 0 : i64, scratch_operands = 1 : i64, tpu.core_type = #tpu.core_type<tc>, window_params = [{transform_indices = @transform_0, window_bounds = array<i64: 32, 128>}, {transform_indices = @transform_1, window_bounds = array<i64: 32, 128>}, {transform_indices = @transform_2, window_bounds = array<i64: 32, 1>}, {transform_indices = @transform_3, window_bounds = array<i64: 32, 1>}, {transform_indices = @transform_4, window_bounds = array<i64: 1, 1>}]} {
    %c0_i32 = arith.constant 0 : i32
    %0 = arith.cmpi eq, %arg0, %c0_i32 : i32
    %1 = arith.extui %0 : i1 to i32
    %c0_i32_0 = arith.constant 0 : i32
    %2 = arith.cmpi ne, %1, %c0_i32_0 : i32
    scf.if %2 {
      %cst_23 = arith.constant 0.000000e+00 : f32
      %c0_24 = arith.constant 0 : index
      %50 = memref.load %arg6[%c0_24] : memref<2xf32, #tpu.memory_space<smem>>
      memref.store %cst_23, %arg6[%c0_24] : memref<2xf32, #tpu.memory_space<smem>>
      %cst_25 = arith.constant 0.000000e+00 : f32
      %c1_26 = arith.constant 1 : index
      %51 = memref.load %arg6[%c1_26] : memref<2xf32, #tpu.memory_space<smem>>
      memref.store %cst_25, %arg6[%c1_26] : memref<2xf32, #tpu.memory_space<smem>>
    } else {
    }
    %c0 = arith.constant 0 : index
    %c0_1 = arith.constant 0 : index
    %3 = vector.load %arg1[%c0, %c0_1] : memref<32x128xf32, #tpu.memory_space<vmem>>, vector<32x128xf32>
    %c0_2 = arith.constant 0 : index
    %c0_3 = arith.constant 0 : index
    %4 = vector.load %arg2[%c0_2, %c0_3] : memref<32x128xi8, #tpu.memory_space<vmem>>, vector<32x128xi8>
    %5 = arith.sitofp %4 : vector<32x128xi8> to vector<32x128xf32>
    %c0_4 = arith.constant 0 : index
    %c0_5 = arith.constant 0 : index
    %6 = vector.load %arg3[%c0_4, %c0_5] : memref<32x1xi32, #tpu.memory_space<vmem>>, vector<32x1xi32>
    %c0_6 = arith.constant 0 : index
    %c0_7 = arith.constant 0 : index
    %7 = vector.load %arg4[%c0_6, %c0_7] : memref<32x1xf32, #tpu.memory_space<vmem>>, vector<32x1xf32>
    %8 = tpu.iota {dimensions = array<i32: 1>} : vector<32x128xi32>
    %9 = vector.broadcast %6 : vector<32x1xi32> to vector<32x128xi32>
    %10 = arith.cmpi eq, %8, %9 : vector<32x128xi32>
    %cst = arith.constant 0.000000e+00 : f32
    %11 = vector.broadcast %cst : f32 to vector<32x128xf32>
    %12 = arith.select %10, %3, %11 : vector<32x128xi1>, vector<32x128xf32>
    %cst_8 = arith.constant dense<0.000000e+00> : vector<32xf32>
    %13 = vector.multi_reduction <add>, %12, %cst_8 [1] : vector<32x128xf32> to vector<32xf32>
    %14 = vector.shape_cast %13 : vector<32xf32> to vector<32x1xf32>
    %cst_9 = arith.constant 0.000000e+00 : f32
    %15 = vector.broadcast %cst_9 : f32 to vector<32x128xf32>
    %16 = arith.cmpf ogt, %5, %15 : vector<32x128xf32>
    %cst_10 = arith.constant 1.000000e+00 : f32
    %17 = vector.broadcast %cst_10 : f32 to vector<32x128xf32>
    %18 = arith.mulf %3, %17 : vector<32x128xf32>
    %cst_11 = arith.constant 0xFF800000 : f32
    %19 = vector.broadcast %cst_11 : f32 to vector<32x128xf32>
    %20 = arith.select %16, %18, %19 : vector<32x128xi1>, vector<32x128xf32>
    %21 = math.exp %20 : vector<32x128xf32>
    %cst_12 = arith.constant dense<0.000000e+00> : vector<32xf32>
    %22 = vector.multi_reduction <add>, %21, %cst_12 [1] : vector<32x128xf32> to vector<32xf32>
    %23 = vector.shape_cast %22 : vector<32xf32> to vector<32x1xf32>
    %cst_13 = arith.constant 1.000000e+00 : f32
    %24 = vector.broadcast %cst_13 : f32 to vector<32x1xf32>
    %25 = arith.mulf %14, %24 : vector<32x1xf32>
    %cst_14 = arith.constant 9.99999968E-21 : f32
    %26 = vector.broadcast %cst_14 : f32 to vector<32x1xf32>
    %27 = arith.addf %23, %26 : vector<32x1xf32>
    %28 = math.log %27 : vector<32x1xf32>
    %29 = arith.subf %25, %28 : vector<32x1xf32>
    %cst_15 = arith.constant 0.000000e+00 : f32
    %30 = vector.broadcast %cst_15 : f32 to vector<32x1xf32>
    %31 = arith.subf %30, %29 : vector<32x1xf32>
    %c0_16 = arith.constant 0 : index
    %32 = memref.load %arg6[%c0_16] : memref<2xf32, #tpu.memory_space<smem>>
    %33 = arith.mulf %31, %7 : vector<32x1xf32>
    %34 = vector.shape_cast %33 : vector<32x1xf32> to vector<1x32x1xf32>
    %cst_17 = arith.constant dense<0.000000e+00> : vector<1xf32>
    %35 = vector.multi_reduction <add>, %34, %cst_17 [1, 2] : vector<1x32x1xf32> to vector<1xf32>
    %36 = vector.shape_cast %35 : vector<1xf32> to vector<1x1x1xf32>
    %37 = vector.extract %36[0, 0, 0] : f32 from vector<1x1x1xf32>
    %38 = arith.addf %32, %37 : f32
    %c0_18 = arith.constant 0 : index
    %39 = memref.load %arg6[%c0_18] : memref<2xf32, #tpu.memory_space<smem>>
    memref.store %38, %arg6[%c0_18] : memref<2xf32, #tpu.memory_space<smem>>
    %c1 = arith.constant 1 : index
    %40 = memref.load %arg6[%c1] : memref<2xf32, #tpu.memory_space<smem>>
    %41 = vector.shape_cast %7 : vector<32x1xf32> to vector<1x32x1xf32>
    %cst_19 = arith.constant dense<0.000000e+00> : vector<1xf32>
    %42 = vector.multi_reduction <add>, %41, %cst_19 [1, 2] : vector<1x32x1xf32> to vector<1xf32>
    %43 = vector.shape_cast %42 : vector<1xf32> to vector<1x1x1xf32>
    %44 = vector.extract %43[0, 0, 0] : f32 from vector<1x1x1xf32>
    %45 = arith.addf %40, %44 : f32
    %c1_20 = arith.constant 1 : index
    %46 = memref.load %arg6[%c1_20] : memref<2xf32, #tpu.memory_space<smem>>
    memref.store %45, %arg6[%c1_20] : memref<2xf32, #tpu.memory_space<smem>>
    %c0_i32_21 = arith.constant 0 : i32
    %47 = arith.cmpi eq, %arg0, %c0_i32_21 : i32
    %48 = arith.extui %47 : i1 to i32
    %c0_i32_22 = arith.constant 0 : i32
    %49 = arith.cmpi ne, %48, %c0_i32_22 : i32
    scf.if %49 {
      %c1_23 = arith.constant 1 : index
      %50 = memref.load %arg6[%c1_23] : memref<2xf32, #tpu.memory_space<smem>>
      %cst_24 = arith.constant 0.000000e+00 : f32
      %51 = arith.cmpf ogt, %50, %cst_24 : f32
      %c0_25 = arith.constant 0 : index
      %52 = memref.load %arg6[%c0_25] : memref<2xf32, #tpu.memory_space<smem>>
      %53 = arith.divf %52, %50 : f32
      %cst_26 = arith.constant 0.000000e+00 : f32
      %54 = arith.select %51, %53, %cst_26 : f32
      %c0_27 = arith.constant 0 : index
      %c0_28 = arith.constant 0 : index
      %55 = memref.load %arg5[%c0_27, %c0_28] : memref<1x1xf32, #tpu.memory_space<smem>>
      memref.store %54, %arg5[%c0_27, %c0_28] : memref<1x1xf32, #tpu.memory_space<smem>>
    } else {
    }
    return
  }
  func.func @transform_0(%arg0: i32) -> (i32, i32) {
    %c0_i32 = arith.constant 0 : i32
    %c0_i32_0 = arith.constant 0 : i32
    return %arg0, %c0_i32 : i32, i32
  }
  func.func @transform_1(%arg0: i32) -> (i32, i32) {
    %c0_i32 = arith.constant 0 : i32
    %c0_i32_0 = arith.constant 0 : i32
    return %arg0, %c0_i32 : i32, i32
  }
  func.func @transform_2(%arg0: i32) -> (i32, i32) {
    %c0_i32 = arith.constant 0 : i32
    %c0_i32_0 = arith.constant 0 : i32
    return %arg0, %c0_i32 : i32, i32
  }
  func.func @transform_3(%arg0: i32) -> (i32, i32) {
    %c0_i32 = arith.constant 0 : i32
    %c0_i32_0 = arith.constant 0 : i32
    return %arg0, %c0_i32 : i32, i32
  }
  func.func @transform_4(%arg0: i32) -> (i32, i32) {
    %c0_i32 = arith.constant 0 : i32
    %c0_i32_0 = arith.constant 0 : i32
    %c0_i32_1 = arith.constant 0 : i32
    return %c0_i32, %c0_i32_0 : i32, i32
  }
}

</mosaic_0001>

<bundles_post_ra>
// kernel: tpu_custom_call.1
= control target key start
LH: loop header
LB: loop body
LE: loop exit
PB: predicated region body
PF: predicated region fallthrough
CT: control target
= control target key end

     0   :  { %v234_v2 = vmov 0   ;;  %s320_s0 = inlined_call_operand.vmem [shape: f32[32,128], index: 0, kind: input, shape index: {}]   ;;  %s321_s1 = inlined_call_operand.vmem [shape: s8[32,128], index: 1, kind: input, shape index: {}]   ;;  %s322_s2 = inlined_call_operand.vmem [shape: s32[32,1], index: 2, kind: input, shape index: {}]   ;;  %s323_s3 = inlined_call_operand.vmem [shape: f32[32,1], index: 3, kind: input, shape index: {}]   ;;  %s324_s4 = inlined_call_operand.hbm [shape: f32[1,1], index: 4, kind: output, shape index: {}]  }
   0x1   :  { %v41_v0 = vld [vmem:[%s322_s2 + $0x10] sm:$0xff]  ;;  %v39_v1 = vld [vmem:[%s322_s2] sm:$0xff]  ;;  %203 = vset.pattern.permute.xlu1 %v234_v2  ;;  %202 = vset.pattern.permute.xlu0 %v234_v2  ;;  %v42_v3 = vld [vmem:[%s322_s2 + $0x18] sm:$0xff] }
   0x2   :  { %56 = vperm.xlu1 %203, %v41_v0   ;;  %50 = vperm.xlu0 %202, %v39_v1   ;;  %v40_v4 = vld [vmem:[%s322_s2 + $0x8] sm:$0xff]  ;;  %v30_v5 = vld [vmem:[%s321_s1] sm:$0xff] }
   0x3   :  { %9 = vsyncpa [#allocation4], 0  ;;  %v31_v6 = vunpack.c.0.s8 %v30_v5  ;;  %v33_v8 = vunpack.c.2.s8 %v30_v5  ;;  %v32_v9 = vunpack.c.1.s8 %v30_v5  ;;  %v26_v10 = vld [vmem:[%s320_s0] sm:$0xff]  ;;  %v34_v12 = vunpack.c.3.s8 %v30_v5  ;;  %v28_v15 = vld [vmem:[%s320_s0 + $0x10] sm:$0xff]  ;;  %s222_s17 = scalar_lea.hbm %s324_s4, 16 }
   0x4   :  { %v27_v17 = vld [vmem:[%s320_s0 + $0x8] sm:$0xff]  ;;  %v29_v21 = vld [vmem:[%s320_s0 + $0x18] sm:$0xff]  ;;  %v47_v30 = vlaneseq  ;;  %v43_v40 = vld [vmem:[%s323_s3] sm:$0xff]  ;;  %vm126_vm8 = vcmask 7168   ;;  %p223_p1 = scmp.ne.s32.totalorder %s324_s4, %s222_s17  ;;  %p226_p2 = scmp.lt.u32.totalorder %s222_s17, %s324_s4 }
   0x5   :  { %v35_v7 = vcvt.s32.f32 %v31_v6  ;;  %v37_v11 = vcvt.s32.f32 %v33_v8  ;;  %v36_v13 = vcvt.s32.f32 %v32_v9  ;;  %v38_v16 = vcvt.s32.f32 %v34_v12  ;;  %v44_v42 = vld [vmem:[%s323_s3 + $0x8] sm:$0xff]  ;;  %v45_v44 = vld [vmem:[%s323_s3 + $0x10] sm:$0xff]  ;;  %v46_v47 = vld [vmem:[%s323_s3 + $0x18] sm:$0xff] }
   0x6   :  { %59 = vperm.xlu1 %203, %v42_v3   ;;  %53 = vperm.xlu0 %202, %v40_v4   ;;  %v48_v31 = vand.u32 127, %v47_v30  ;;  %v147_v41 = vsel %vm126_vm8, %v43_v40, 0.0  ;;  %v148_v43 = vsel %vm126_vm8, %v44_v42, 0.0  ;;  %v150_v46 = vsel %vm126_vm8, %v45_v44, 0.0  ;;  %p228_p3 = pnand %p226_p2, %p223_p1 }
   0x7   :  { %vm77_vm0 = vcmp.gt.f32.partialorder %v35_v7, 0.0  ;;  %vm79_vm1 = vcmp.gt.f32.partialorder %v37_v11, 0.0  ;;  %vm78_vm2 = vcmp.gt.f32.partialorder %v36_v13, 0.0  ;;  %vm80_vm3 = vcmp.gt.f32.partialorder %v38_v16, 0.0 }
   0x8   :  { %v81_v14 = vsel %vm77_vm0, %v26_v10, -inf  ;;  %v83_v19 = vsel %vm79_vm1, %v28_v15, -inf  ;;  %v82_v20 = vsel %vm78_vm2, %v27_v17, -inf  ;;  %v84_v24 = vsel %vm80_vm3, %v29_v21, -inf }
   0x9   :  { %v85_v18 = vmul.f32 1.442695, %v81_v14  ;;  %v89_v22 = vmul.f32 1.442695, %v83_v19  ;;  %v87_v23 = vmul.f32 1.442695, %v82_v20  ;;  %v149_v45 = vadd.f32 %v148_v43, %v147_v41 }
   0xa   :  { %v91_v25 = vmul.f32 1.442695, %v84_v24  ;;  %v152_v49 = vsel %vm126_vm8, %v46_v47, 0.0 }
   0xb   :  { %204 = vpow2.f32 %v85_v18  ;;  %v151_v48 = vadd.f32 %v150_v46, %v149_v45 }
   0xc   :  { %206 = vpow2.f32 %v89_v22 }
   0xd   :  { %208 = vpow2.f32 %v87_v23  ;;  %v153_v50 = vadd.f32 %v152_v49, %v151_v48 }
   0xe   :  { %210 = vpow2.f32 %v91_v25 }
  0x15   :  { %v205_v26 = vpop.eup %204 }
  0x16   :  { %v207_v27 = vpop.eup %206 }
  0x17   :  { %v209_v28 = vpop.eup %208 }
  0x18   :  { %v211_v29 = vpop.eup %210 }
  0x25   :  { %93 = vadd.xlane.f32.xlu0 %v205_v26 }
  0x29   :  { %97 = vadd.xlane.f32.xlu0 %v207_v27 }
  0x2a   :  { %95 = vadd.xlane.f32.xlu1 %v209_v28 }
  0x2d   :  { %99 = vadd.xlane.f32.xlu0 %v211_v29 }
  0x81   :  { %v57_v32 = vpop.permute.xlu1 %56  ;;  %v51_v33 = vpop.permute.xlu0 %50 }
  0x82   :  { %vm63_vm4 = vcmp.eq.s32.totalorder %v48_v31, %v57_v32  ;;  %vm61_vm5 = vcmp.eq.s32.totalorder %v48_v31, %v51_v33 }
  0x83   :  { %v65_v34 = vsel %vm61_vm5, %v26_v10, 0.0  ;;  %v67_v37 = vsel %vm63_vm4, %v28_v15, 0.0 }
  0x84   :  { %69 = vadd.xlane.f32.xlu1 %v65_v34 }
  0x85   :  { %v60_v35 = vpop.permute.xlu1 %59  ;;  %v54_v36 = vpop.permute.xlu0 %53 }
  0x86   :  { %vm62_vm6 = vcmp.eq.s32.totalorder %v48_v31, %v54_v36  ;;  %vm64_vm7 = vcmp.eq.s32.totalorder %v48_v31, %v60_v35 }
  0x87   :  { %v66_v38 = vsel %vm62_vm6, %v27_v17, 0.0  ;;  %v68_v39 = vsel %vm64_vm7, %v29_v21, 0.0 }
  0x88   :  { %71 = vadd.xlane.f32.xlu0 %v66_v38  ;;  %73 = vadd.xlane.f32.xlu1 %v67_v37 }
  0x8c   :  { %75 = vadd.xlane.f32.xlu0 %v68_v39 }
  0x90   :  { %154 = vadd.xlane.f32.xlu0 %v153_v50 }
  0xb2   :  { %v94_v51 = vpop.xlane.xlu0 %93 }
  0xb3   :  { %v101_v53 = vadd.f32 1e-20, %v94_v51 }
  0xb5   :  { %212 = vlog2.f32 %v101_v53 }
  0xb6   :  { %v98_v52 = vpop.xlane.xlu0 %97 }
  0xb7   :  { %v96_v54 = vpop.xlane.xlu1 %95  ;;  %v103_v55 = vadd.f32 1e-20, %v98_v52 }
  0xb8   :  { %v102_v56 = vadd.f32 1e-20, %v96_v54 }
  0xb9   :  { %214 = vlog2.f32 %v103_v55 }
  0xba   :  { %v100_v57 = vpop.xlane.xlu0 %99  ;;  %216 = vlog2.f32 %v102_v56 }
  0xbb   :  { %v104_v58 = vadd.f32 1e-20, %v100_v57 }
  0xbd   :  { %218 = vlog2.f32 %v104_v58 }
  0xbf   :  { %v213_v59 = vpop.eup %212 }
  0xc0   :  { %v106_v61 = vmul.f32 0.6931472, %v213_v59 }
  0xc3   :  { %v215_v60 = vpop.eup %214 }
  0xc4   :  { %v217_v62 = vpop.eup %216  ;;  %v110_v2 = vmul.f32 0.6931472, %v215_v60 }
  0xc5   :  { %v108_v1 = vmul.f32 0.6931472, %v217_v62 }
  0xc7   :  { %v219_v3 = vpop.eup %218 }
  0xc8   :  { %v112_v9 = vmul.f32 0.6931472, %v219_v3 }
 0x111   :  { %v70_v63 = vpop.xlane.xlu1 %69 }
 0x112   :  { %v113_v0 = vsub.f32 %v70_v63, %v106_v61 }
 0x114   :  { %v117_v4 = vsub.f32 0.0, %v113_v0 }
 0x115   :  { %v72_v5 = vpop.xlane.xlu0 %71  ;;  %v74_v6 = vpop.xlane.xlu1 %73 }
 0x116   :  { %v114_v7 = vsub.f32 %v72_v5, %v108_v1  ;;  %v115_v8 = vsub.f32 %v74_v6, %v110_v2  ;;  %v122_v10 = vmul.f32 %v117_v4, %v43_v40 }
 0x118   :  { %v118_v11 = vsub.f32 0.0, %v114_v7  ;;  %v119_v12 = vsub.f32 0.0, %v115_v8  ;;  %v127_v17 = vsel %vm126_vm8, %v122_v10, 0.0 }
 0x119   :  { %v76_v13 = vpop.xlane.xlu0 %75 }
 0x11a   :  { %v123_v14 = vmul.f32 %v118_v11, %v44_v42  ;;  %v124_v15 = vmul.f32 %v119_v12, %v45_v44  ;;  %v116_v16 = vsub.f32 %v76_v13, %v112_v9 }
 0x11c   :  { %v128_v18 = vsel %vm126_vm8, %v123_v14, 0.0  ;;  %v120_v19 = vsub.f32 0.0, %v116_v16  ;;  %v130_v22 = vsel %vm126_vm8, %v124_v15, 0.0 }
 0x11d   :  { %v129_v20 = vadd.f32 %v128_v18, %v127_v17  ;;  %v155_v26 = vpop.xlane.xlu0 %154 }
 0x11e   :  { %v125_v21 = vmul.f32 %v120_v19, %v46_v47  ;;  %v156_v27 = vrot.slane %v155_v26, 4 }
 0x11f   :  { %v131_v23 = vadd.f32 %v130_v22, %v129_v20 }
 0x120   :  { %v132_v24 = vsel %vm126_vm8, %v125_v21, 0.0  ;;  %v157_v28 = vadd.f32 %v156_v27, %v155_v26 }
 0x121   :  { %v133_v25 = vadd.f32 %v132_v24, %v131_v23 }
 0x122   :  { %v158_v29 = vrot.slane %v157_v28, 2 }
 0x123   :  { %134 = vadd.xlane.f32.xlu1 %v133_v25 }
 0x124   :  { %v159_v33 = vadd.f32 %v158_v29, %v157_v28 }
 0x126   :  { %v160_v36 = vrot.slane %v159_v33, 1 }
 0x128   :  { %v161_v39 = vadd.f32 %v160_v36, %v159_v33 }
 0x1b0   :  { %v135_v30 = vpop.xlane.xlu1 %134 }
 0x1b1   :  { %v136_v31 = vrot.slane %v135_v30, 4 }
 0x1b3   :  { %v137_v32 = vadd.f32 %v136_v31, %v135_v30 }
 0x1b5   :  { %v138_v34 = vrot.slane %v137_v32, 2 }
 0x1b7   :  { %v139_v35 = vadd.f32 %v138_v34, %v137_v32 }
 0x1b9   :  { %v140_v37 = vrot.slane %v139_v35, 1 }
 0x1bb   :  { %v141_v38 = vadd.f32 %v140_v37, %v139_v35 }
 0x1bd   :  { %194 = vpush %v141_v38 }
 0x1be   :  { %196 = vpush %v161_v39 }
 0x1ee   :  { %s195_s3 = spop %194 }
 0x1ef   :  { %s197_s12 = spop %196 }
 0x1f0   :  { %v172_v40 = vstv %s197_s12  ;;  %p170_p0 = scmp.gt.f32.partialorder %s197_s12, 0.0 }
 0x1f1   :  { %220 = vrcp.f32 %v172_v40 }
 0x1fb   :  { %v221_v41 = vpop.eup %220 }
 0x1fc   :  { %198 = vpush %v221_v41 }
 0x22d   :  { %s199_s13 = spop %198 }
 0x22e   :  { %s175_s14 = smul.f32 %s199_s13, %s195_s3 }
 0x230   :  { %s326_s14 = smov (!%p170_p0, %s175_s14), 0.0 }
 0x231   :  { %178 = sst [smem:[#allocation3]] %s326_s14 }
 0x232   :  { %231 = shalt.err (!%p228_p3)
}
 0x233   :  { %s235_s22 = smov [#allocation3]  }
 0x234   :  { %186 = dma.smem_to_hbm %s235_s22, 16, %s324_s4, [#allocation4]  }
 0x235   :  { %232 = dma.done.wait [#allocation4], 16  }
 0x236   :  { %233 = vsyncadd [#allocation4], 4294967280 }
 0x237   :  { %190 = sfence }
 0x238   :  { %191 = vsyncpa [#allocation4], 1 }

</bundles_post_ra>
